<compile_context>
chip_gen: v7x
topology: tpu7x:2x2x1
jax: 0.10.0
libtpu: 0.0.40
codegen_flags: <defaults>
</compile_context>

<pallas_src>
import numpy as np
import jax
import jax.numpy as jnp
from jax.experimental import pallas as pl
from jax.experimental.pallas import tpu as pltpu

VMEM_SPEC = pl.BlockSpec(memory_space=pltpu.MemorySpace.VMEM)
SMEM_SPEC = pl.BlockSpec(memory_space=pltpu.MemorySpace.SMEM)
_BN_EPS = 1e-5


def _pick_vmem_limit():
    """Generation-aware scoped-VMEM limit (v5e default is only 16 MiB)."""
    cap = 64 * 1024 * 1024
    try:
        info = pltpu.get_tpu_info()
        cap = int(getattr(info, "vmem_capacity_bytes", cap))
    except Exception:
        pass
    # 128 MiB parts (v5e/v6e) -> 96 MiB; 64 MiB/TC (v7x) -> 48 MiB.
    return int(min(cap * 3 // 4, 112 * 1024 * 1024))


_CPARAMS = pltpu.CompilerParams(vmem_limit_bytes=_pick_vmem_limit())


# ----------------------------------------------------------------------------
# Pallas kernels
# ----------------------------------------------------------------------------
def _make_mewis_fused_kernel(has_edges: bool, feat_dim: int):
    """Fused MEWISPool hot path: entropy + segment-softmax + 3x(GIN+MLP) + loss.

    A is loaded into VMEM once and reused by every matmul in the kernel.
    """

    def kernel(x_ref, xcat_ref, a_ref, dl_ref, s_ref,
               w11, b11, w12, b12, w13, b13,
               w21, b21, w22, b22, w23, b23,
               w31, b31, w32, b32, w33, b33,
               ep_ref, scal_ref):
        A = a_ref[...]                                   # [N,N] bf16 (0/1 exact)

        if has_edges:
            # ---- compute_entropy:  V = dl*x^2 - 2*x*(A@x) + A@(x^2) ----------
            # (L = diag(diag(L)) - A  =>  L@x = dl*x - A@x, dl = diag(L))
            x = x_ref[...]                               # [N,F] f32
            x2 = x * x
            # A@x and A@(x^2) in ONE matmul on the pre-built bf16 [x | x^2].
            prod = jnp.dot(A, xcat_ref[...], preferred_element_type=jnp.float32)
            Ax = prod[:, :feat_dim]
            Axx = prod[:, feat_dim:]
            V = dl_ref[...] * x2 - 2.0 * x * Ax + Axx
            Vn = jnp.sqrt(jnp.sum(V * V, axis=1, keepdims=True))           # [N,1]

            # ---- per-graph softmax via one-hot segment matrix S [N,G] --------
            S = s_ref[...]
            masked = jnp.where(S > 0.0, Vn, -1e30)                          # [N,G]
            segmax = jnp.max(masked, axis=0, keepdims=True)                 # [1,G]
            eV = jnp.exp(Vn - jnp.sum(S * segmax, axis=1, keepdims=True))   # [N,1]
            segsum = jnp.sum(S * eV, axis=0, keepdims=True)                 # [1,G]
            P = eV / jnp.sum(S * segsum, axis=1, keepdims=True)             # [N,1]
            P = jnp.where(P == 0.0, P + 1.0, P)
            H = -P * jnp.log(P)                                             # entropies
        else:
            # Reference uses norm/norm (== 1 for nonzero rows); guarded to ones
            # to avoid NaN on all-zero feature rows.
            H = jnp.ones((a_ref.shape[0], 1), jnp.float32)

        # ---- three GINConv(MLP) blocks -------------------------------------
        def gin_block(e, w1, b1, w2, b2, w3, b3):
            # (e + A@e)@W1 == e@W1 + A@(e@W1): the A-matmul RHS is hidden-wide
            # even when e has a single feature column.
            t = jnp.dot(e.astype(jnp.bfloat16), w1[...],
                        preferred_element_type=jnp.float32)
            t = t + jnp.dot(A, t.astype(jnp.bfloat16),
                            preferred_element_type=jnp.float32)
            y = jnp.maximum(t + b1[...], 0.0)
            y = jnp.maximum(
                jnp.dot(y.astype(jnp.bfloat16), w2[...],
                        preferred_element_type=jnp.float32) + b2[...], 0.0)
            y = jnp.maximum(
                jnp.dot(y.astype(jnp.bfloat16), w3[...],
                        preferred_element_type=jnp.float32) + b3[...], 0.0)
            return y

        p = gin_block(H, w11, b11, w12, b12, w13, b13)
        p = gin_block(p, w21, b21, w22, b22, w23, b23)
        p = gin_block(p, w31, b31, w32, b32, w33, b33)
        probs = 1.0 / (1.0 + jnp.exp(-p))                 # sigmoid

        # combined [entropy | prob] output -> single [N,2] store / DMA pass.
        # TODO(synk): large-N version should emit a lane-dense [2,N] slab.
        ep_ref[:, 0:1] = H
        ep_ref[:, 1:2] = probs

        # ---- loss_fn: gamma - e^T p + p^T A p ------------------------------
        # Reuse the resident bf16 A directly (no f32 copy of A); probs in bf16
        # add ~0.4% error to p^T A p (documented greedy-threshold drift).
        gamma = jnp.sum(H)
        term1 = -jnp.sum(H * probs)
        Ap = jnp.dot(A, probs.astype(jnp.bfloat16),
                     preferred_element_type=jnp.float32)
        term2 = jnp.sum(probs * Ap)
        scal_ref[0, 0] = gamma + term1 + term2
        scal_ref[0, 1] = gamma

    return kernel


def _make_gin_stack_kernel(n_blocks: int):
    """n_blocks x [GINConv(MLP enhance=True)]; BN (eval) folded into W/b on the
    host; dropout = identity. A is read into VMEM once and reused."""

    def kernel(*refs):
        x_ref, a_ref = refs[0], refs[1]
        o_ref = refs[-1]
        A = a_ref[...]                                    # [N,N] bf16
        y = x_ref[...]                                    # [N,din] f32
        for b in range(n_blocks):
            w1, b1, w2, b2, w3, b3 = refs[2 + 6 * b: 8 + 6 * b]
            t = jnp.dot(y.astype(jnp.bfloat16), w1[...],
                        preferred_element_type=jnp.float32)
            t = t + jnp.dot(A, t.astype(jnp.bfloat16),
                            preferred_element_type=jnp.float32)
            # fc1(+BN folded) -> relu -> (dropout=id)
            y = jnp.maximum(t + b1[...], 0.0)
            # fc2(+BN folded) -> relu -> (dropout=id)
            y = jnp.maximum(
                jnp.dot(y.astype(jnp.bfloat16), w2[...],
                        preferred_element_type=jnp.float32) + b2[...], 0.0)
            # relu(fc3); the extra torch.relu in Net3 after each GINConv is
            # idempotent after this.
            y = jnp.maximum(
                jnp.dot(y.astype(jnp.bfloat16), w3[...],
                        preferred_element_type=jnp.float32) + b3[...], 0.0)
        o_ref[...] = y

    return kernel


def _pooled_adj_kernel(arows_ref, a_ref, sel_ref, out_ref):
    """adj_pooled = (1 - I) * clamp(A2[m,m] + A3[m,m], 0, 1).

    Only [m,:]/[:,m] sub-products are formed; the [:,m] columns are produced
    in-kernel as A @ Sel (one-hot selector) on the MXU instead of a stride-N
    host/XLA column gather of A."""
    Ar = arows_ref[...]                                   # [k,N] bf16
    A = a_ref[...]                                        # [N,N] bf16
    Sel = sel_ref[...]                                    # [N,k] bf16 one-hot
    Ac = jnp.dot(A, Sel, preferred_element_type=jnp.float32)         # [N,k]=A[:,m]
    Ac_bf = Ac.astype(jnp.bfloat16)                                   # 0/1 exact
    A2s = jnp.dot(Ar, Ac_bf, preferred_element_type=jnp.float32)     # [k,k]
    T = jnp.dot(Ar, A, preferred_element_type=jnp.float32)           # [k,N]
    A3s = jnp.dot(T.astype(jnp.bfloat16), Ac_bf,
                  preferred_element_type=jnp.float32)                # [k,k]
    k = A2s.shape[0]
    ii = jax.lax.broadcasted_iota(jnp.int32, (k, k), 0)
    jj = jax.lax.broadcasted_iota(jnp.int32, (k, k), 1)
    off_diag = (ii != jj).astype(jnp.float32)
    clamped = jnp.minimum(jnp.maximum(A2s + A3s, 0.0), 1.0)
    out_ref[...] = off_diag * clamped


def _head_kernel(smean_ref, x_ref, w1_ref, b1_ref, w2_ref, b2_ref, o_ref):
    """segment-mean readout -> fc1 -> relu -> fc2 -> log_softmax, fused."""
    readout = jnp.dot(smean_ref[...], x_ref[...],
                      preferred_element_type=jnp.float32)            # [G,H]
    y = jnp.maximum(
        jnp.dot(readout, w1_ref[...], preferred_element_type=jnp.float32)
        + b1_ref[...], 0.0)
    logits = jnp.dot(y, w2_ref[...], preferred_element_type=jnp.float32) + b2_ref[...]
    m = jnp.max(logits, axis=-1, keepdims=True)
    z = logits - m
    lse = jnp.log(jnp.sum(jnp.exp(z), axis=-1, keepdims=True))
    o_ref[...] = z - lse


# ----------------------------------------------------------------------------
# Pallas wrappers
# ----------------------------------------------------------------------------
def fused_mewis_forward(x, xcat, A_bf, dl, S, params, has_edges):
    N, F = int(x.shape[0]), int(x.shape[1])
    G = int(S.shape[1])
    Hdim = int(params["gc1"][2].shape[0])

    flat = []
    for blk in ("gc1", "gc2", "gc3"):
        flat += list(params[blk])          # weights pre-cast to bf16 at build

    cost = pl.CostEstimate(
        flops=int(2 * N * N * (2 * F + 3 * Hdim + 1) + 14 * N * Hdim * Hdim),
        transcendentals=int(6 * N),
        bytes_accessed=int(2 * N * N + 4 * N * (3 * F + G + 4) + 6 * Hdim * Hdim))

    kernel = _make_mewis_fused_kernel(has_edges, F)
    ep, scal = pl.pallas_call(
        kernel,
        out_shape=(jax.ShapeDtypeStruct((N, 2), jnp.float32),
                   jax.ShapeDtypeStruct((1, 2), jnp.float32)),
        in_specs=[VMEM_SPEC] * (5 + len(flat)),
        out_specs=(VMEM_SPEC, SMEM_SPEC),
        compiler_params=_CPARAMS,
        cost_estimate=cost,
    )(x, xcat, A_bf, dl, S, *flat)
    return ep, scal


def enhanced_gin_stack(x, A_bf, blocks):
    """Apply consecutive enhanced GINConv(MLP) blocks with one A residency."""
    x = jnp.asarray(x, jnp.float32)
    N = int(x.shape[0])
    flat = []
    for blk in blocks:
        flat += list(blk)                  # (w1_bf, b1, w2_bf, b2, w3_bf, b3)
    dout = int(blocks[-1][4].shape[1])
    kernel = _make_gin_stack_kernel(len(blocks))
    return pl.pallas_call(
        kernel,
        out_shape=jax.ShapeDtypeStruct((N, dout), jnp.float32),
        in_specs=[VMEM_SPEC] * (2 + len(flat)),
        out_specs=VMEM_SPEC,
        compiler_params=_CPARAMS,
    )(x, A_bf, *flat)


def classifier_head(smean, x, fc1, fc2):
    w1t, b1 = fc1
    w2t, b2 = fc2
    G, C = int(smean.shape[0]), int(w2t.shape[1])
    return pl.pallas_call(
        _head_kernel,
        out_shape=jax.ShapeDtypeStruct((G, C), jnp.float32),
        in_specs=[VMEM_SPEC] * 6,
        out_specs=VMEM_SPEC,
        compiler_params=_CPARAMS,
    )(smean, x, w1t, b1, w2t, b2)


# ----------------------------------------------------------------------------
# MEWISPool glue (host python / tiny JAX where no clean Pallas equivalent)
# ----------------------------------------------------------------------------
def conditional_expectation(entropies, probabilities, A_np, threshold, gamma):
    # TODO(synk): data-dependent greedy loop with dynamic sets stays on host;
    # candidate losses are exact O(deg^2) incremental updates from cached
    # e.q, q^T A q, A q, A^T q (no per-candidate kernel dispatch / round trip).
    e = np.asarray(entropies, dtype=np.float64)[:, 0]
    q = np.asarray(probabilities, dtype=np.float64)[:, 0]
    A = np.asarray(A_np, dtype=np.float64)
    thr = float(threshold)
    gam = float(gamma)

    Aq = A @ q
    ATq = A.T @ q
    e_dot_q = float(e @ q)
    qAq = float(q @ Aq)

    order = np.argsort(-q, kind="stable")
    selected, rejected = set(), set()
    for idx in order:
        i = int(idx)
        # NOTE: like the reference, only exact-weight-1 entries count as
        # neighbors (duplicate edges would accumulate to 2 and be skipped).
        nbrs = np.where(A[i] == 1)[0]
        if nbrs.size == 0:
            selected.add(i)
            continue
        if i in rejected or i in selected:
            continue
        # candidate s = q with s[i]=1 then s[nbrs]=0 (reference assignment order)
        new_vals = {i: 1.0}
        for j in nbrs:
            new_vals[int(j)] = 0.0
        nz = np.fromiter(new_vals.keys(), dtype=np.int64)
        d = np.array([new_vals[int(j)] - q[int(j)] for j in nz], dtype=np.float64)

        e_dot_s = e_dot_q + float(e[nz] @ d)
        sAs = (qAq + float(d @ Aq[nz]) + float(d @ ATq[nz])
               + float(d @ A[np.ix_(nz, nz)] @ d))
        loss = gam - e_dot_s + sAs
        if loss <= thr:
            selected.add(i)
            rejected.update(int(n) for n in nbrs)
            # commit q <- s and refresh caches incrementally
            Aq = Aq + A[:, nz] @ d
            ATq = ATq + d @ A[nz, :]
            e_dot_q = e_dot_s
            qAq = sAs
            q[nz] = q[nz] + d
    return sorted(selected)


def graph_reconstruction(mewis, x, A_bf):
    m = np.asarray(mewis, dtype=np.int32)
    k = int(m.shape[0])
    x = jnp.asarray(x, jnp.float32)
    if k == 0:
        return jnp.zeros((0, int(x.shape[1])), jnp.float32), np.zeros((0, 0), np.float32)
    m_dev = jnp.asarray(m)
    x_pooled = x[m_dev]                                   # device row gather
    Arows = A_bf[m_dev, :]                                # [k,N] contiguous rows
    Sel = jax.nn.one_hot(m_dev, A_bf.shape[0], dtype=jnp.bfloat16).T   # [N,k]
    adj_pooled = pl.pallas_call(
        _pooled_adj_kernel,
        out_shape=jax.ShapeDtypeStruct((k, k), jnp.float32),
        in_specs=[VMEM_SPEC] * 3,
        out_specs=VMEM_SPEC,
        compiler_params=_CPARAMS,
    )(Arows, A_bf, Sel)
    return x_pooled, np.asarray(adj_pooled)


def to_edge_index(adj_pooled, mewis, batch):
    r1, r2 = np.where(adj_pooled > 0)
    edge_index_pooled = np.stack([r1, r2], axis=0).astype(np.int32)
    batch_pooled = np.asarray(batch)[np.asarray(mewis, dtype=np.int64)]
    return edge_index_pooled, batch_pooled


def mewis_pool_forward(params, x, edge_index, batch, num_graphs):
    batch_np = np.asarray(batch)
    N = int(batch_np.shape[0])
    x = jnp.asarray(x, jnp.float32)
    has_edges = int(edge_index.shape[1]) != 0

    # A / diag(L) built once on the host: the greedy loop needs host A anyway,
    # so this removes a per-pool [N,N] device->host pull.
    if has_edges:
        src = np.asarray(edge_index[0])
        dst = np.asarray(edge_index[1])
        A_w = np.zeros((N, N), np.float32)
        np.add.at(A_w, (src, dst), 1.0)
        deg_w = A_w.sum(axis=1)
        diag_w = np.diag(A_w).copy()
        A_np = A_w - np.diag(diag_w)                 # == diag(diag(L)) - L
        dl_np = (deg_w - diag_w)[:, None].astype(np.float32)   # == diag(L)
    else:
        A_np = np.zeros((N, N), np.float32)
        dl_np = np.zeros((N, 1), np.float32)

    S_np = (batch_np[:, None] == np.arange(num_graphs)[None, :]).astype(np.float32)

    A_bf = jnp.asarray(A_np, dtype=jnp.bfloat16)     # 0/1 values: exact in bf16
    dl = jnp.asarray(dl_np)
    S = jnp.asarray(S_np)
    xcat = jnp.concatenate([x, x * x], axis=-1).astype(jnp.bfloat16)   # [N,2F]

    ep, scal = fused_mewis_forward(x, xcat, A_bf, dl, S, params, has_edges)

    # single device->host sync for everything the greedy loop needs
    ep_np = np.asarray(ep)
    scal_np = np.asarray(scal)
    entropies = ep_np[:, 0:1]
    probabilities = ep_np[:, 1:2]
    loss_f = float(scal_np[0, 0])
    gamma = float(scal_np[0, 1])

    mewis = conditional_expectation(entropies, probabilities, A_np, loss_f, gamma)
    x_pooled, adj_pooled = graph_reconstruction(mewis, x, A_bf)
    edge_index_pooled, batch_pooled = to_edge_index(adj_pooled, mewis, batch_np)
    loss = jnp.float32(loss_f)
    return x_pooled, edge_index_pooled, batch_pooled, loss, mewis


# ----------------------------------------------------------------------------
# Net3 forward
# ----------------------------------------------------------------------------
def build_msg_adj(edge_index, n):
    """Dense GIN message-passing matrix: out[t] += x[s] for each edge (s, t)."""
    if int(edge_index.shape[1]) == 0:
        return jnp.zeros((n, n), jnp.bfloat16)
    src = jnp.asarray(edge_index[0])
    dst = jnp.asarray(edge_index[1])
    M = jnp.zeros((n, n), jnp.float32).at[dst, src].add(1.0)
    return M.astype(jnp.bfloat16)


def net3_forward(params, x, edge_index, batch, num_graphs):
    N = int(np.asarray(batch).shape[0])
    x = jnp.asarray(x, jnp.float32)

    # gc1 + gc2 fused (A resident once); extra torch.relu is idempotent.
    A_msg = build_msg_adj(edge_index, N)
    x = enhanced_gin_stack(x, A_msg, [params["gc1"], params["gc2"]])

    x_p1, ei_p1, b_p1, loss1, _ = mewis_pool_forward(
        params["pool1"], x, edge_index, batch, num_graphs)

    k1 = int(x_p1.shape[0])
    A1_msg = build_msg_adj(ei_p1, k1)
    x_p1 = enhanced_gin_stack(x_p1, A1_msg, [params["gc3"], params["gc4"]])

    x_p2, ei_p2, b_p2, loss2, _ = mewis_pool_forward(
        params["pool2"], x_p1, ei_p1, b_p1, num_graphs)

    k2 = int(x_p2.shape[0])
    A2_msg = build_msg_adj(ei_p2, k2)
    x_p2 = enhanced_gin_stack(x_p2, A2_msg, [params["gc5"]])

    # readout: per-graph mean over graphs present after pooling, done on device
    # via a segment-mean matrix fused into the head kernel (x_p2 never leaves
    # the device). Graphs fully pooled away are dropped, like the reference.
    b2_np = np.asarray(b_p2)
    uniq = np.unique(b2_np)
    Smean = np.zeros((uniq.shape[0], k2), np.float32)
    for r, g in enumerate(uniq):
        idx = np.where(b2_np == g)[0]
        Smean[r, idx] = 1.0 / float(idx.shape[0])

    log_probs = classifier_head(jnp.asarray(Smean), x_p2,
                                params["fc1"], params["fc2"])
    return log_probs, loss1 + loss2


# ----------------------------------------------------------------------------
# Parameters (deterministic init; PyTorch Linear weights stored pre-transposed
# [in,out]; BatchNorm folded into W/b in eval mode; dropout = identity; matmul
# weights pre-cast to bf16 once)
# ----------------------------------------------------------------------------
def make_net3_params(input_dim, hidden_dim, num_classes, key):
    def linear(k, din, dout, scale=0.2):
        return (scale * jax.random.normal(k, (din, dout), jnp.float32),
                jnp.full((1, dout), 0.01, jnp.float32))

    # TODO(synk): BatchNorm uses eval-mode running stats (mean=0, var=1,
    # weight=1, bias=0) folded into the preceding Linear; dropout is identity.
    s_bn = np.float32(1.0 / np.sqrt(1.0 + _BN_EPS))
    t_bn = np.float32(0.0)

    def enhanced_block(k, din, dh, dout):
        k1, k2, k3 = jax.random.split(k, 3)
        w1, b1 = linear(k1, din, dh)
        w2, b2 = linear(k2, dh, dh)
        w3, b3 = linear(k3, dh, dout)
        w1f, b1f = w1 * s_bn, b1 * s_bn + t_bn
        w2f, b2f = w2 * s_bn, b2 * s_bn + t_bn
        return (w1f.astype(jnp.bfloat16), b1f,
                w2f.astype(jnp.bfloat16), b2f,
                w3.astype(jnp.bfloat16), b3)

    def pool_params(k, dh):
        def mlp(kk, din, dhh, dout):
            ka, kb, kc = jax.random.split(kk, 3)
            w1, b1 = linear(ka, din, dhh)
            w2, b2 = linear(kb, dhh, dhh)
            w3, b3 = linear(kc, dhh, dout)
            return (w1.astype(jnp.bfloat16), b1,
                    w2.astype(jnp.bfloat16), b2,
                    w3.astype(jnp.bfloat16), b3)
        k1, k2, k3 = jax.random.split(k, 3)
        return {"gc1": mlp(k1, 1, dh, dh),
                "gc2": mlp(k2, dh, dh, dh),
                "gc3": mlp(k3, dh, dh, 1)}

    keys = jax.random.split(key, 9)
    return {
        "gc1": enhanced_block(keys[0], input_dim, hidden_dim, hidden_dim),
        "gc2": enhanced_block(keys[1], hidden_dim, hidden_dim, hidden_dim),
        "pool1": pool_params(keys[2], hidden_dim),
        "gc3": enhanced_block(keys[3], hidden_dim, hidden_dim, hidden_dim),
        "gc4": enhanced_block(keys[4], hidden_dim, hidden_dim, hidden_dim),
        "pool2": pool_params(keys[5], hidden_dim),
        "gc5": enhanced_block(keys[6], hidden_dim, hidden_dim, hidden_dim),
        "fc1": linear(keys[7], hidden_dim, hidden_dim),
        "fc2": linear(keys[8], hidden_dim, num_classes),
    }


# ----------------------------------------------------------------------------
# Example run
# ----------------------------------------------------------------------------
if __name__ == "__main__":
    key = jax.random.PRNGKey(0)
    k_x, k_p = jax.random.split(key)

    N_PER_GRAPH, NUM_GRAPHS, FEAT, HIDDEN, NUM_CLASSES = 8, 2, 8, 32, 2
    N = N_PER_GRAPH * NUM_GRAPHS

    # node features [N, FEAT]
    x = jax.random.normal(k_x, (N, FEAT), jnp.float32)

    # ring graph inside each of the two graphs, both edge directions
    edges = []
    for g in range(NUM_GRAPHS):
        off = g * N_PER_GRAPH
        for i in range(N_PER_GRAPH):
            j = (i + 1) % N_PER_GRAPH
            edges.append((off + i, off + j))
            edges.append((off + j, off + i))
    edge_index = jnp.asarray(np.array(edges, dtype=np.int32).T)   # [2, E]
    batch = jnp.asarray(np.repeat(np.arange(NUM_GRAPHS, dtype=np.int32), N_PER_GRAPH))

    params = make_net3_params(FEAT, HIDDEN, NUM_CLASSES, k_p)

    log_probs, total_loss = net3_forward(params, x, edge_index, batch, NUM_GRAPHS)

    jax.block_until_ready((log_probs, total_loss))
    print("KERNEL_OK")
</pallas_src>

<mosaic_0001>
module attributes {stable_mosaic.version = 11 : i64} {
  func.func @kernel(%arg0: memref<16x8xf32, #tpu.memory_space<vmem>>, %arg1: memref<16x16xbf16, #tpu.memory_space<vmem>>, %arg2: memref<8x32xbf16, #tpu.memory_space<vmem>>, %arg3: memref<1x32xf32, #tpu.memory_space<vmem>>, %arg4: memref<32x32xbf16, #tpu.memory_space<vmem>>, %arg5: memref<1x32xf32, #tpu.memory_space<vmem>>, %arg6: memref<32x32xbf16, #tpu.memory_space<vmem>>, %arg7: memref<1x32xf32, #tpu.memory_space<vmem>>, %arg8: memref<32x32xbf16, #tpu.memory_space<vmem>>, %arg9: memref<1x32xf32, #tpu.memory_space<vmem>>, %arg10: memref<32x32xbf16, #tpu.memory_space<vmem>>, %arg11: memref<1x32xf32, #tpu.memory_space<vmem>>, %arg12: memref<32x32xbf16, #tpu.memory_space<vmem>>, %arg13: memref<1x32xf32, #tpu.memory_space<vmem>>, %arg14: memref<16x32xf32, #tpu.memory_space<vmem>>) attributes {dimension_semantics = [], scalar_prefetch = 0 : i64, scratch_operands = 0 : i64, tpu.core_type = #tpu.core_type<tc>} {
    %c0 = arith.constant 0 : index
    %c0_0 = arith.constant 0 : index
    %0 = vector.load %arg1[%c0, %c0_0] : memref<16x16xbf16, #tpu.memory_space<vmem>>, vector<16x16xbf16>
    %c0_1 = arith.constant 0 : index
    %c0_2 = arith.constant 0 : index
    %1 = vector.load %arg0[%c0_1, %c0_2] : memref<16x8xf32, #tpu.memory_space<vmem>>, vector<16x8xf32>
    %2 = arith.truncf %1 : vector<16x8xf32> to vector<16x8xbf16>
    %c0_3 = arith.constant 0 : index
    %c0_4 = arith.constant 0 : index
    %3 = vector.load %arg2[%c0_3, %c0_4] : memref<8x32xbf16, #tpu.memory_space<vmem>>, vector<8x32xbf16>
    %cst = arith.constant dense<0.000000e+00> : vector<16x32xf32>
    %4 = tpu.matmul %2, %3, %cst {dimension_numbers = #tpu.dot_dimension_numbers<[1], [0], [0], [1], [0, 0, 1, 1], [], []>} : vector<16x8xbf16>, vector<8x32xbf16>, vector<16x32xf32> -> vector<16x32xf32>
    %5 = arith.truncf %4 : vector<16x32xf32> to vector<16x32xbf16>
    %cst_5 = arith.constant dense<0.000000e+00> : vector<16x32xf32>
    %6 = tpu.matmul %0, %5, %cst_5 {dimension_numbers = #tpu.dot_dimension_numbers<[1], [0], [0], [1], [0, 0, 1, 1], [], []>} : vector<16x16xbf16>, vector<16x32xbf16>, vector<16x32xf32> -> vector<16x32xf32>
    %7 = arith.addf %4, %6 : vector<16x32xf32>
    %c0_6 = arith.constant 0 : index
    %c0_7 = arith.constant 0 : index
    %8 = vector.load %arg3[%c0_6, %c0_7] : memref<1x32xf32, #tpu.memory_space<vmem>>, vector<1x32xf32>
    %9 = vector.broadcast %8 : vector<1x32xf32> to vector<16x32xf32>
    %10 = arith.addf %7, %9 : vector<16x32xf32>
    %cst_8 = arith.constant 0.000000e+00 : f32
    %11 = vector.broadcast %cst_8 : f32 to vector<16x32xf32>
    %12 = arith.maximumf %10, %11 : vector<16x32xf32>
    %13 = arith.truncf %12 : vector<16x32xf32> to vector<16x32xbf16>
    %c0_9 = arith.constant 0 : index
    %c0_10 = arith.constant 0 : index
    %14 = vector.load %arg4[%c0_9, %c0_10] : memref<32x32xbf16, #tpu.memory_space<vmem>>, vector<32x32xbf16>
    %cst_11 = arith.constant dense<0.000000e+00> : vector<16x32xf32>
    %15 = tpu.matmul %13, %14, %cst_11 {dimension_numbers = #tpu.dot_dimension_numbers<[1], [0], [0], [1], [0, 0, 1, 1], [], []>} : vector<16x32xbf16>, vector<32x32xbf16>, vector<16x32xf32> -> vector<16x32xf32>
    %c0_12 = arith.constant 0 : index
    %c0_13 = arith.constant 0 : index
    %16 = vector.load %arg5[%c0_12, %c0_13] : memref<1x32xf32, #tpu.memory_space<vmem>>, vector<1x32xf32>
    %17 = vector.broadcast %16 : vector<1x32xf32> to vector<16x32xf32>
    %18 = arith.addf %15, %17 : vector<16x32xf32>
    %cst_14 = arith.constant 0.000000e+00 : f32
    %19 = vector.broadcast %cst_14 : f32 to vector<16x32xf32>
    %20 = arith.maximumf %18, %19 : vector<16x32xf32>
    %21 = arith.truncf %20 : vector<16x32xf32> to vector<16x32xbf16>
    %c0_15 = arith.constant 0 : index
    %c0_16 = arith.constant 0 : index
    %22 = vector.load %arg6[%c0_15, %c0_16] : memref<32x32xbf16, #tpu.memory_space<vmem>>, vector<32x32xbf16>
    %cst_17 = arith.constant dense<0.000000e+00> : vector<16x32xf32>
    %23 = tpu.matmul %21, %22, %cst_17 {dimension_numbers = #tpu.dot_dimension_numbers<[1], [0], [0], [1], [0, 0, 1, 1], [], []>} : vector<16x32xbf16>, vector<32x32xbf16>, vector<16x32xf32> -> vector<16x32xf32>
    %c0_18 = arith.constant 0 : index
    %c0_19 = arith.constant 0 : index
    %24 = vector.load %arg7[%c0_18, %c0_19] : memref<1x32xf32, #tpu.memory_space<vmem>>, vector<1x32xf32>
    %25 = vector.broadcast %24 : vector<1x32xf32> to vector<16x32xf32>
    %26 = arith.addf %23, %25 : vector<16x32xf32>
    %cst_20 = arith.constant 0.000000e+00 : f32
    %27 = vector.broadcast %cst_20 : f32 to vector<16x32xf32>
    %28 = arith.maximumf %26, %27 : vector<16x32xf32>
    %29 = arith.truncf %28 : vector<16x32xf32> to vector<16x32xbf16>
    %c0_21 = arith.constant 0 : index
    %c0_22 = arith.constant 0 : index
    %30 = vector.load %arg8[%c0_21, %c0_22] : memref<32x32xbf16, #tpu.memory_space<vmem>>, vector<32x32xbf16>
    %cst_23 = arith.constant dense<0.000000e+00> : vector<16x32xf32>
    %31 = tpu.matmul %29, %30, %cst_23 {dimension_numbers = #tpu.dot_dimension_numbers<[1], [0], [0], [1], [0, 0, 1, 1], [], []>} : vector<16x32xbf16>, vector<32x32xbf16>, vector<16x32xf32> -> vector<16x32xf32>
    %32 = arith.truncf %31 : vector<16x32xf32> to vector<16x32xbf16>
    %cst_24 = arith.constant dense<0.000000e+00> : vector<16x32xf32>
    %33 = tpu.matmul %0, %32, %cst_24 {dimension_numbers = #tpu.dot_dimension_numbers<[1], [0], [0], [1], [0, 0, 1, 1], [], []>} : vector<16x16xbf16>, vector<16x32xbf16>, vector<16x32xf32> -> vector<16x32xf32>
    %34 = arith.addf %31, %33 : vector<16x32xf32>
    %c0_25 = arith.constant 0 : index
    %c0_26 = arith.constant 0 : index
    %35 = vector.load %arg9[%c0_25, %c0_26] : memref<1x32xf32, #tpu.memory_space<vmem>>, vector<1x32xf32>
    %36 = vector.broadcast %35 : vector<1x32xf32> to vector<16x32xf32>
    %37 = arith.addf %34, %36 : vector<16x32xf32>
    %cst_27 = arith.constant 0.000000e+00 : f32
    %38 = vector.broadcast %cst_27 : f32 to vector<16x32xf32>
    %39 = arith.maximumf %37, %38 : vector<16x32xf32>
    %40 = arith.truncf %39 : vector<16x32xf32> to vector<16x32xbf16>
    %c0_28 = arith.constant 0 : index
    %c0_29 = arith.constant 0 : index
    %41 = vector.load %arg10[%c0_28, %c0_29] : memref<32x32xbf16, #tpu.memory_space<vmem>>, vector<32x32xbf16>
    %cst_30 = arith.constant dense<0.000000e+00> : vector<16x32xf32>
    %42 = tpu.matmul %40, %41, %cst_30 {dimension_numbers = #tpu.dot_dimension_numbers<[1], [0], [0], [1], [0, 0, 1, 1], [], []>} : vector<16x32xbf16>, vector<32x32xbf16>, vector<16x32xf32> -> vector<16x32xf32>
    %c0_31 = arith.constant 0 : index
    %c0_32 = arith.constant 0 : index
    %43 = vector.load %arg11[%c0_31, %c0_32] : memref<1x32xf32, #tpu.memory_space<vmem>>, vector<1x32xf32>
    %44 = vector.broadcast %43 : vector<1x32xf32> to vector<16x32xf32>
    %45 = arith.addf %42, %44 : vector<16x32xf32>
    %cst_33 = arith.constant 0.000000e+00 : f32
    %46 = vector.broadcast %cst_33 : f32 to vector<16x32xf32>
    %47 = arith.maximumf %45, %46 : vector<16x32xf32>
    %48 = arith.truncf %47 : vector<16x32xf32> to vector<16x32xbf16>
    %c0_34 = arith.constant 0 : index
    %c0_35 = arith.constant 0 : index
    %49 = vector.load %arg12[%c0_34, %c0_35] : memref<32x32xbf16, #tpu.memory_space<vmem>>, vector<32x32xbf16>
    %cst_36 = arith.constant dense<0.000000e+00> : vector<16x32xf32>
    %50 = tpu.matmul %48, %49, %cst_36 {dimension_numbers = #tpu.dot_dimension_numbers<[1], [0], [0], [1], [0, 0, 1, 1], [], []>} : vector<16x32xbf16>, vector<32x32xbf16>, vector<16x32xf32> -> vector<16x32xf32>
    %c0_37 = arith.constant 0 : index
    %c0_38 = arith.constant 0 : index
    %51 = vector.load %arg13[%c0_37, %c0_38] : memref<1x32xf32, #tpu.memory_space<vmem>>, vector<1x32xf32>
    %52 = vector.broadcast %51 : vector<1x32xf32> to vector<16x32xf32>
    %53 = arith.addf %50, %52 : vector<16x32xf32>
    %cst_39 = arith.constant 0.000000e+00 : f32
    %54 = vector.broadcast %cst_39 : f32 to vector<16x32xf32>
    %55 = arith.maximumf %53, %54 : vector<16x32xf32>
    %c0_40 = arith.constant 0 : index
    %c0_41 = arith.constant 0 : index
    %56 = vector.load %arg14[%c0_40, %c0_41] : memref<16x32xf32, #tpu.memory_space<vmem>>, vector<16x32xf32>
    tpu.vector_store %arg14[%c0_40, %c0_41], %55 {strides = array<i32>} : memref<16x32xf32, #tpu.memory_space<vmem>>, vector<16x32xf32>,
    return
  }
}

</mosaic_0001>

<bundles_post_ra>
// kernel: tpu_custom_call.1
= control target key start
LH: loop header
LB: loop body
LE: loop exit
PB: predicated region body
PF: predicated region fallthrough
CT: control target
= control target key end

     0   :  { %19 = vsyncpa [#allocation3], 0  ;;  %s1257_s0 = inlined_call_operand.vmem [shape: f32[16,8], index: 0, kind: input, shape index: {}]   ;;  %s1258_s1 = inlined_call_operand.hbm [shape: bf16[16,16], index: 1, kind: input, shape index: {}]   ;;  %s1259_s2 = inlined_call_operand.hbm [shape: bf16[8,32], index: 2, kind: input, shape index: {}]   ;;  %s1260_s3 = inlined_call_operand.vmem [shape: f32[1,32], index: 3, kind: input, shape index: {}]   ;;  %s1261_s4 = inlined_call_operand.vmem [shape: bf16[32,32], index: 4, kind: input, shape index: {}]   ;;  %s1262_s5 = inlined_call_operand.hbm [shape: f32[1,32], index: 5, kind: input, shape index: {}]   ;;  %s1263_s6 = inlined_call_operand.vmem [shape: bf16[32,32], index: 6, kind: input, shape index: {}]   ;;  %s1264_s7 = inlined_call_operand.hbm [shape: f32[1,32], index: 7, kind: input, shape index: {}]   ;;  %s1265_s8 = inlined_call_operand.vmem [shape: bf16[32,32], index: 8, kind: input, shape index: {}]   ;;  %s1266_s9 = inlined_call_operand.hbm [shape: f32[1,32], index: 9, kind: input, shape index: {}]   ;;  %s1267_s10 = inlined_call_operand.hbm [shape: bf16[32,32], index: 10, kind: input, shape index: {}]   ;;  %s1268_s11 = inlined_call_operand.hbm [shape: f32[1,32], index: 11, kind: input, shape index: {}]   ;;  %s1269_s12 = inlined_call_operand.vmem [shape: bf16[32,32], index: 12, kind: input, shape index: {}]   ;;  %s1270_s13 = inlined_call_operand.vmem [shape: f32[1,32], index: 13, kind: input, shape index: {}]   ;;  %s1271_s14 = inlined_call_operand.hbm [shape: f32[16,32], index: 14, kind: output, shape index: {}]  }
   0x1   :  { %20 = vsyncpa [#allocation6], 0 }
   0x2   :  { %21 = vsyncpa [#allocation9], 0 }
   0x3   :  { %22 = vsyncpa [#allocation12], 0 }
   0x4   :  { %23 = vsyncpa [#allocation4], 0  ;;  %s987_s29 = smov [#allocation5]   ;;  %s988_s15 = smov [#allocation8]  }
   0x5   :  { %s44_s30 = sshll.u32 %s987_s29, 4  ;;  %s70_s16 = sshll.u32 %s988_s15, 4  ;;  %s45_s30 = int_to_ptr.vmem [resolvable:$true] %s44_s30  ;;  %s71_s16 = int_to_ptr.vmem [resolvable:$true] %s70_s16 }
   0x6   :  { %s801_s19 = scalar_lea.hbm %s1259_s2, 64 }
   0x7   :  { %p802_p0 = scmp.ne.s32.totalorder %s1259_s2, %s801_s19  ;;  %p805_p1 = scmp.lt.u32.totalorder %s801_s19, %s1259_s2 }
   0x9   :  { %p807_p2 = pnand %p805_p1, %p802_p0 }
   0xb   :  { %810 = shalt.err (!%p807_p2)
}
   0xc   :  { %s811_s24 = scalar_lea.vmem %s45_s30, 64  ;;  %p816_p4 = scmp.lt.s32.totalorder %s45_s30, %s45_s30 }
   0xd   :  { %p812_p3 = scmp.ne.s32.totalorder %s45_s30, %s811_s24  ;;  %p817_p5 = scmp.lt.s32.totalorder %s811_s24, %s811_s24 }
   0xf   :  { %p818_p6 = por %p817_p5, %p816_p4 }
  0x11   :  { %p819_p7 = pnand %p818_p6, %p812_p3 }
  0x13   :  { %822 = shalt.err (!%p819_p7)
}
  0x14   :  { %47 = dma.hbm_to_vmem [thread:$0]  %s1259_s2, 64, %s45_s30, [#allocation6]  }
  0x15   :  { %s823_s29 = scalar_lea.hbm %s1264_s7, 16 }
  0x16   :  { %p824_p8 = scmp.ne.s32.totalorder %s1264_s7, %s823_s29  ;;  %p827_p9 = scmp.lt.u32.totalorder %s823_s29, %s1264_s7 }
  0x18   :  { %p829_p10 = pnand %p827_p9, %p824_p8 }
  0x1a   :  { %832 = shalt.err (!%p829_p10)
}
  0x1b   :  { %s833_s20 = scalar_lea.vmem %s71_s16, 16  ;;  %s837_s21 = scalar_lea.vmem %s71_s16, 32 }
  0x1c   :  { %p834_p11 = scmp.ne.s32.totalorder %s71_s16, %s833_s20  ;;  %p838_p12 = scmp.lt.s32.totalorder %s71_s16, %s71_s16 }
  0x1d   :  { %p839_p13 = scmp.lt.s32.totalorder %s837_s21, %s833_s20 }
  0x1f   :  { %p840_p0 = por %p839_p13, %p838_p12 }
  0x21   :  { %p841_p1 = pnand %p840_p0, %p834_p11 }
  0x23   :  { %844 = shalt.err (!%p841_p1)
}
  0x24   :  { %73 = dma.hbm_to_vmem [thread:$0]  %s1264_s7, 16, %s71_s16, [#allocation9]  }
  0x25   :  { %s989_s22 = smov [#allocation11]   ;;  %s990_s24 = smov [#allocation2]  }
  0x26   :  { %s91_s23 = sshll.u32 %s989_s22, 4  ;;  %s31_s25 = sshll.u32 %s990_s24, 4  ;;  %s92_s23 = int_to_ptr.vmem [resolvable:$true] %s91_s23  ;;  %s1100_s25 = int_to_ptr.vmem [resolvable:$true] %s31_s25 }
  0x27   :  { %s845_s28 = scalar_lea.hbm %s1267_s10, 256 }
  0x28   :  { %p846_p2 = scmp.ne.s32.totalorder %s1267_s10, %s845_s28  ;;  %p849_p3 = scmp.lt.u32.totalorder %s845_s28, %s1267_s10 }
  0x2a   :  { %p851_p4 = pnand %p849_p3, %p846_p2 }
  0x2c   :  { %854 = shalt.err (!%p851_p4)
}
  0x2d   :  { %s855_s7 = scalar_lea.vmem %s92_s23, 256  ;;  %p860_p6 = scmp.lt.s32.totalorder %s92_s23, %s92_s23 }
  0x2e   :  { %p856_p5 = scmp.ne.s32.totalorder %s92_s23, %s855_s7  ;;  %p861_p7 = scmp.lt.s32.totalorder %s855_s7, %s855_s7 }
  0x30   :  { %p862_p8 = por %p861_p7, %p860_p6 }
  0x32   :  { %p863_p9 = pnand %p862_p8, %p856_p5 }
  0x34   :  { %866 = shalt.err (!%p863_p9)
}
  0x35   :  { %s991_s16 = smov 64   ;;  %s992_s19 = smov 4  }
  0x36   :  { %97 = dma.hbm_to_vmem [thread:$0]  %s1267_s10, 256, %s92_s23, [#allocation12], %s991_s16, %s991_s16, %s992_s19  }
  0x37   :  { %s867_s22 = scalar_lea.hbm %s1258_s1, 128 }
  0x38   :  { %p868_p10 = scmp.ne.s32.totalorder %s1258_s1, %s867_s22  ;;  %p871_p11 = scmp.lt.u32.totalorder %s867_s22, %s1258_s1 }
  0x3a   :  { %p873_p12 = pnand %p871_p11, %p868_p10 }
  0x3c   :  { %876 = shalt.err (!%p873_p12)
}
  0x3d   :  { %s877_s29 = scalar_lea.vmem %s1100_s25, 128  ;;  %p882_p0 = scmp.lt.s32.totalorder %s1100_s25, %s1100_s25 }
  0x3e   :  { %p878_p13 = scmp.ne.s32.totalorder %s1100_s25, %s877_s29  ;;  %p883_p1 = scmp.lt.s32.totalorder %s877_s29, %s877_s29 }
  0x40   :  { %p884_p2 = por %p883_p1, %p882_p0 }
  0x42   :  { %p885_p3 = pnand %p884_p2, %p878_p13 }
  0x44   :  { %888 = shalt.err (!%p885_p3)
}
  0x45   :  { %37 = dma.hbm_to_vmem [thread:$0]  %s1258_s1, 128, %s1100_s25, [#allocation3], %s991_s16, %s991_s16, %s992_s19  }
  0x46   :  { %s993_s15 = smov [#allocation7]   ;;  %s994_s18 = smov [#allocation10]  }
  0x47   :  { %s58_s17 = sshll.u32 %s993_s15, 4  ;;  %s82_s7 = sshll.u32 %s994_s18, 4  ;;  %s59_s17 = int_to_ptr.vmem [resolvable:$true] %s58_s17  ;;  %s83_s7 = int_to_ptr.vmem [resolvable:$true] %s82_s7 }
  0x48   :  { %s889_s2 = scalar_lea.hbm %s1262_s5, 16 }
  0x49   :  { %p890_p4 = scmp.ne.s32.totalorder %s1262_s5, %s889_s2  ;;  %p893_p5 = scmp.lt.u32.totalorder %s889_s2, %s1262_s5 }
  0x4b   :  { %p895_p6 = pnand %p893_p5, %p890_p4 }
  0x4d   :  { %898 = shalt.err (!%p895_p6)
}
  0x4e   :  { %s899_s1 = scalar_lea.vmem %s59_s17, 16  ;;  %s903_s25 = scalar_lea.vmem %s59_s17, 32 }
  0x4f   :  { %p900_p7 = scmp.ne.s32.totalorder %s59_s17, %s899_s1  ;;  %p904_p8 = scmp.lt.s32.totalorder %s59_s17, %s59_s17 }
  0x50   :  { %p905_p9 = scmp.lt.s32.totalorder %s903_s25, %s899_s1 }
  0x52   :  { %p906_p10 = por %p905_p9, %p904_p8 }
  0x54   :  { %p907_p11 = pnand %p906_p10, %p900_p7 }
  0x56   :  { %910 = shalt.err (!%p907_p11)
}
  0x57   :  { %61 = dma.hbm_to_vmem [thread:$0]  %s1262_s5, 16, %s59_s17, [#allocation6]  }
  0x58   :  { %s911_s29 = scalar_lea.hbm %s1266_s9, 16 }
  0x59   :  { %p912_p12 = scmp.ne.s32.totalorder %s1266_s9, %s911_s29  ;;  %p915_p13 = scmp.lt.u32.totalorder %s911_s29, %s1266_s9 }
  0x5b   :  { %p917_p0 = pnand %p915_p13, %p912_p12 }
  0x5d   :  { %920 = shalt.err (!%p917_p0)
}
  0x5e   :  { %s921_s20 = scalar_lea.vmem %s83_s7, 16  ;;  %s925_s21 = scalar_lea.vmem %s83_s7, 32 }
  0x5f   :  { %p922_p1 = scmp.ne.s32.totalorder %s83_s7, %s921_s20  ;;  %p926_p2 = scmp.lt.s32.totalorder %s83_s7, %s83_s7 }
  0x60   :  { %p927_p3 = scmp.lt.s32.totalorder %s925_s21, %s921_s20 }
  0x62   :  { %p928_p4 = por %p927_p3, %p926_p2 }
  0x64   :  { %p929_p5 = pnand %p928_p4, %p922_p1 }
  0x66   :  { %932 = shalt.err (!%p929_p5)
}
  0x67   :  { %85 = dma.hbm_to_vmem [thread:$0]  %s1266_s9, 16, %s83_s7, [#allocation9]  }
  0x68   :  { %s995_s2 = smov [#allocation13]   ;;  %s933_s26 = scalar_lea.hbm %s1268_s11, 16 }
  0x69   :  { %s104_s30 = sshll.u32 %s995_s2, 4  ;;  %p934_p6 = scmp.ne.s32.totalorder %s1268_s11, %s933_s26  ;;  %s105_s30 = int_to_ptr.vmem [resolvable:$true] %s104_s30 }
  0x6a   :  { %p937_p7 = scmp.lt.u32.totalorder %s933_s26, %s1268_s11 }
  0x6c   :  { %p939_p8 = pnand %p937_p7, %p934_p6 }
  0x6e   :  { %942 = shalt.err (!%p939_p8)
}
  0x6f   :  { %s943_s27 = scalar_lea.vmem %s105_s30, 16  ;;  %s947_s9 = scalar_lea.vmem %s105_s30, 32 }
  0x70   :  { %p944_p9 = scmp.ne.s32.totalorder %s105_s30, %s943_s27  ;;  %p948_p10 = scmp.lt.s32.totalorder %s105_s30, %s105_s30 }
  0x71   :  { %p949_p11 = scmp.lt.s32.totalorder %s947_s9, %s943_s27 }
  0x73   :  { %p950_p12 = por %p949_p11, %p948_p10 }
  0x75   :  { %p951_p13 = pnand %p950_p12, %p944_p9 }
  0x77   :  { %954 = shalt.err (!%p951_p13)
}
  0x78   :  { %107 = dma.hbm_to_vmem [thread:$0]  %s1268_s11, 16, %s105_s30, [#allocation12]  }
  0x79   :  { %977 = dma.done.wait [#allocation3], 128  }
  0x7a   :  { %978 = vsyncadd [#allocation3], 4294967168 }
  0x7b   :  { %979 = dma.done.wait [#allocation6], 80  }
  0x7c   :  { %980 = vsyncadd [#allocation6], 4294967216 }
  0x7d   :  { %981 = dma.done.wait [#allocation9], 32  }
  0x7e   :  { %982 = vsyncadd [#allocation9], 4294967264 }
  0x7f   :  { %983 = dma.done.wait [#allocation12], 272  }
  0x80   :  { %984 = vsyncadd [#allocation12], 4294967024  ;;  %v996_v0 = vmov 0.0   ;;  %vm997_vm0 = vmmov 0   ;;  %vm144_vm1 = vcmask 1043456   ;;  %v136_v2 = vld [vmem:[%s1257_s0] sm:$0xff] }
  0x81   :  { %718 = vmatprep.subr.bf16.mxu0 %v996_v0  ;;  %720 = vmatprep.mubr.msk.bf16.mxu0 %vm997_vm0, %v996_v0  ;;  %v139_v1 = vld [vmem:[#allocation5] sm:$0xf]  ;;  %vm140_vm2 = vcmask 64512   ;;  %v1182_v11 = vld [vmem:[#allocation2] sm:$0xff]   ;;  %vm195_vm3 = vcmask 130048   ;;  %vm277_vm4 = vcmask 261120  }
  0x82   :  { %724 = vmatprep.subr.bf16.mxu1 %v996_v0  ;;  %726 = vmatprep.mubr.msk.bf16.mxu1 %vm997_vm0, %v996_v0  ;;  %v137_v3 = vld [vmem:[%s1257_s0 + $0x8] sm:$0xff]  ;;  %v146_v4 = vsel %vm144_vm1, %v139_v1, 0  ;;  %v791_v12 = vld [vmem:[%s1261_s4] sm:$0xff]   ;;  %v797_v55 = vld [vmem:[#allocation11] sm:$0xff]  }
  0x83   :  { %v138_v5 = vpack.c.bf16 %v137_v3, %v136_v2  ;;  %719 = vmatpush3.bf16.msra.mxu0 %v146_v4  ;;  %v792_v13 = vld [vmem:[%s1261_s4 + $0x8] sm:$0xff]   ;;  %v675_v15 = vld [vmem:[%s1260_s3] ss:$0 sm:$0xff]  ;;  %v688_v58 = vld [vmem:[#allocation10] ss:$0 sm:$0xff] }
  0x84   :  { %730 = vmatprep.subr.bf16.mxu0 %v996_v0  ;;  %v793_v26 = vld [vmem:[%s1263_s6] sm:$0xff]   ;;  %v794_v27 = vld [vmem:[%s1263_s6 + $0x8] sm:$0xff]  }
  0x85   :  { %v676_v28 = vld [vmem:[#allocation7] ss:$0 sm:$0xff]  ;;  %v795_v38 = vld [vmem:[%s1265_s8] sm:$0xff]   ;;  %v680_v40 = vld [vmem:[#allocation8] ss:$0 sm:$0xff] }
  0x86   :  { %721 = vmatmul.mubr.msk.bf16.vlgmr.msra.gmra.mrb[0].mxu0 %vm140_vm2, %v138_v5  ;;  %v796_v39 = vld [vmem:[%s1265_s8 + $0x8] sm:$0xff]   ;;  %v798_v56 = vld [vmem:[#allocation11 + $0x8] sm:$0xff]  }
  0x87   :  { %734 = vmatprep.mubr.msk.bf16.mxu0 %vm997_vm0, %v996_v0  ;;  %731 = vmatpush3.bf16.msra.mxu0 %v791_v12 }
  0x88   :  { %732 = vmatprep.subr.bf16.mxu0 %v996_v0 }
  0x8b   :  { %733 = vmatpush3.bf16.msra.mxu0 %v792_v13 }
  0x8c   :  { %746 = vmatprep.subr.bf16.mxu0 %v996_v0 }
 0x159   :  { %v182_v6 = vpop.f32.mrb[0].mxu0 }
 0x15a   :  { %v722_v7 = vpop.f32.mrb[1].mxu0 }
 0x15b   :  { %v185_v8 = vpop.f32.mrb[2].mxu0  ;;  %v800_v7 = vld [vmem:[%s1269_s12 + $0x8] sm:$0xff]  }
 0x15c   :  { %v723_v9 = vpop.f32.mrb[3].mxu0  ;;  %v189_v10 = vpack.c.bf16 %v185_v8, %v182_v6 }
 0x15e   :  { %725 = vmatpush3.bf16.msra.mxu1 %v189_v10 }
 0x15f   :  { %738 = vmatprep.subr.bf16.mxu1 %v996_v0 }
 0x161   :  { %727 = vmatmul.mubr.msk.bf16.vlgmr.msra.gmra.mrb[0].mxu1 %vm195_vm3, %v1182_v11 }
 0x162   :  { %742 = vmatprep.mubr.msk.bf16.mxu1 %vm997_vm0, %v996_v0  ;;  %739 = vmatpush3.bf16.msra.mxu1 %v793_v26 }
 0x163   :  { %740 = vmatprep.subr.bf16.mxu1 %v996_v0 }
 0x166   :  { %741 = vmatpush3.bf16.msra.mxu1 %v794_v27 }
 0x167   :  { %754 = vmatprep.subr.bf16.mxu1 %v996_v0 }
 0x234   :  { %v233_v14 = vpop.f32.mrb[0].mxu1 }
 0x235   :  { %v240_v16 = vadd.f32 %v233_v14, %v182_v6  ;;  %v728_v17 = vpop.f32.mrb[1].mxu1  ;;  %v799_v6 = vld [vmem:[%s1269_s12] sm:$0xff]   ;;  %s998_s12 = smov [#allocation14]  }
 0x236   :  { %v236_v18 = vpop.f32.mrb[2].mxu1  ;;  %s657_s27 = sshll.u32 %s998_s12, 4  ;;  %s658_s27 = int_to_ptr.vmem [resolvable:$true] %s657_s27 }
 0x237   :  { %v249_v19 = vadd.f32 %v675_v15, %v240_v16  ;;  %v241_v20 = vadd.f32 %v236_v18, %v185_v8  ;;  %v729_v21 = vpop.f32.mrb[3].mxu1  ;;  %v689_v8 = vld [vmem:[#allocation13] ss:$0 sm:$0xff]  ;;  %s955_s9 = scalar_lea.vmem %s658_s27, 256  ;;  %p960_p1 = scmp.lt.s32.totalorder %s658_s27, %s658_s27 }
 0x238   :  { %p956_p0 = scmp.ne.s32.totalorder %s658_s27, %s955_s9  ;;  %p961_p2 = scmp.lt.s32.totalorder %s955_s9, %s955_s9 }
 0x239   :  { %v250_v22 = vadd.f32 %v675_v15, %v241_v20  ;;  %v251_v23 = vmax.f32 %v249_v19, 0.0 }
 0x23a   :  { %p962_p3 = por %p961_p2, %p960_p1 }
 0x23b   :  { %v252_v24 = vmax.f32 %v250_v22, 0.0 }
 0x23c   :  { %p963_p4 = pnand %p962_p3, %p956_p0 }
 0x23d   :  { %v253_v25 = vpack.c.bf16 %v252_v24, %v251_v23 }
 0x23f   :  { %735 = vmatmul.mubr.msk.bf16.vlgmr.msra.gmra.mrb[4].mxu0 %vm277_vm4, %v253_v25 }
 0x240   :  { %750 = vmatprep.mubr.msk.bf16.mxu0 %vm997_vm0, %v996_v0  ;;  %747 = vmatpush3.bf16.msra.mxu0 %v795_v38 }
 0x241   :  { %748 = vmatprep.subr.bf16.mxu0 %v996_v0 }
 0x244   :  { %749 = vmatpush3.bf16.msra.mxu0 %v796_v39 }
 0x245   :  { %760 = vmatprep.subr.bf16.mxu0 %v996_v0 }
 0x312   :  { %v315_v29 = vpop.f32.mrb[4].mxu0 }
 0x313   :  { %v316_v30 = vadd.f32 %v676_v28, %v315_v29  ;;  %v736_v31 = vpop.f32.mrb[5].mxu0 }
 0x314   :  { %v318_v32 = vpop.f32.mrb[6].mxu0 }
 0x315   :  { %v319_v33 = vadd.f32 %v676_v28, %v318_v32  ;;  %v737_v34 = vpop.f32.mrb[7].mxu0  ;;  %v322_v35 = vmax.f32 %v316_v30, 0.0 }
 0x317   :  { %v323_v36 = vmax.f32 %v319_v33, 0.0 }
 0x319   :  { %v324_v37 = vpack.c.bf16 %v323_v36, %v322_v35 }
 0x31b   :  { %743 = vmatmul.mubr.msk.bf16.vlgmr.msra.gmra.mrb[4].mxu1 %vm277_vm4, %v324_v37 }
 0x31c   :  { %756 = vmatprep.mubr.msk.bf16.mxu1 %vm997_vm0, %v996_v0 }
 0x3ee   :  { %v385_v41 = vpop.f32.mrb[4].mxu1 }
 0x3ef   :  { %v386_v42 = vadd.f32 %v680_v40, %v385_v41  ;;  %v744_v43 = vpop.f32.mrb[5].mxu1 }
 0x3f0   :  { %v388_v44 = vpop.f32.mrb[6].mxu1 }
 0x3f1   :  { %v389_v45 = vadd.f32 %v680_v40, %v388_v44  ;;  %v745_v46 = vpop.f32.mrb[7].mxu1  ;;  %v392_v47 = vmax.f32 %v386_v42, 0.0 }
 0x3f3   :  { %v393_v48 = vmax.f32 %v389_v45, 0.0 }
 0x3f5   :  { %v394_v49 = vpack.c.bf16 %v393_v48, %v392_v47 }
 0x3f7   :  { %751 = vmatmul.mubr.msk.bf16.vlgmr.msra.gmra.mrb[8].mxu0 %vm277_vm4, %v394_v49 }
 0x3f8   :  { %764 = vmatprep.mubr.msk.bf16.mxu0 %vm997_vm0, %v996_v0  ;;  %761 = vmatpush3.bf16.msra.mxu0 %v797_v55 }
 0x3f9   :  { %762 = vmatprep.subr.bf16.mxu0 %v996_v0 }
 0x3fc   :  { %763 = vmatpush3.bf16.msra.mxu0 %v798_v56 }
 0x4ca   :  { %v448_v50 = vpop.f32.mrb[8].mxu0 }
 0x4cb   :  { %v752_v51 = vpop.f32.mrb[9].mxu0 }
 0x4cc   :  { %v451_v52 = vpop.f32.mrb[10].mxu0 }
 0x4cd   :  { %v455_v53 = vpack.c.bf16 %v451_v52, %v448_v50  ;;  %v753_v54 = vpop.f32.mrb[11].mxu0 }
 0x4cf   :  { %755 = vmatpush3.bf16.msra.mxu1 %v455_v53 }
 0x4d0   :  { %768 = vmatprep.subr.bf16.mxu1 %v996_v0 }
 0x4d2   :  { %757 = vmatmul.mubr.msk.bf16.vlgmr.msra.gmra.mrb[8].mxu1 %vm195_vm3, %v1182_v11 }
 0x4d3   :  { %772 = vmatprep.mubr.msk.bf16.mxu1 %vm997_vm0, %v996_v0  ;;  %769 = vmatpush3.bf16.msra.mxu1 %v799_v6 }
 0x4d4   :  { %770 = vmatprep.subr.bf16.mxu1 %v996_v0  ;;  %v693_v0 = vld [vmem:[%s1270_s13] ss:$0 sm:$0xff] }
 0x4d7   :  { %771 = vmatpush3.bf16.msra.mxu1 %v800_v7 }
 0x5a5   :  { %v490_v57 = vpop.f32.mrb[8].mxu1 }
 0x5a6   :  { %v497_v59 = vadd.f32 %v490_v57, %v448_v50  ;;  %v758_v60 = vpop.f32.mrb[9].mxu1 }
 0x5a7   :  { %v493_v61 = vpop.f32.mrb[10].mxu1 }
 0x5a8   :  { %v506_v62 = vadd.f32 %v688_v58, %v497_v59  ;;  %v498_v63 = vadd.f32 %v493_v61, %v451_v52  ;;  %v759_v1 = vpop.f32.mrb[11].mxu1 }
 0x5aa   :  { %v507_v2 = vadd.f32 %v688_v58, %v498_v63  ;;  %v508_v3 = vmax.f32 %v506_v62, 0.0 }
 0x5ac   :  { %v509_v4 = vmax.f32 %v507_v2, 0.0 }
 0x5ae   :  { %v510_v5 = vpack.c.bf16 %v509_v4, %v508_v3 }
 0x5b0   :  { %765 = vmatmul.mubr.msk.bf16.vlgmr.msra.gmra.mrb[12].mxu0 %vm277_vm4, %v510_v5 }
 0x683   :  { %v571_v9 = vpop.f32.mrb[12].mxu0 }
 0x684   :  { %v572_v10 = vadd.f32 %v689_v8, %v571_v9  ;;  %v766_v11 = vpop.f32.mrb[13].mxu0 }
 0x685   :  { %v574_v12 = vpop.f32.mrb[14].mxu0 }
 0x686   :  { %v575_v13 = vadd.f32 %v689_v8, %v574_v12  ;;  %v767_v14 = vpop.f32.mrb[15].mxu0  ;;  %v578_v15 = vmax.f32 %v572_v10, 0.0 }
 0x688   :  { %v579_v16 = vmax.f32 %v575_v13, 0.0 }
 0x68a   :  { %v580_v17 = vpack.c.bf16 %v579_v16, %v578_v15 }
 0x68c   :  { %773 = vmatmul.mubr.msk.bf16.vlgmr.msra.gmra.mrb[12].mxu1 %vm277_vm4, %v580_v17 }
 0x75f   :  { %v641_v18 = vpop.f32.mrb[12].mxu1 }
 0x760   :  { %v642_v19 = vadd.f32 %v693_v0, %v641_v18  ;;  %v774_v20 = vpop.f32.mrb[13].mxu1 }
 0x761   :  { %v644_v21 = vpop.f32.mrb[14].mxu1 }
 0x762   :  { %v648_v22 = vmax.f32 %v642_v19, 0.0  ;;  %v645_v23 = vadd.f32 %v693_v0, %v644_v21  ;;  %v775_v24 = vpop.f32.mrb[15].mxu1 }
 0x764   :  { %650 = vst.msk [vmem:[#allocation14] sm:$0xff] %vm277_vm4, %v648_v22  ;;  %v649_v25 = vmax.f32 %v645_v23, 0.0 }
 0x766   :  { %651 = vst.msk [vmem:[#allocation14 + $0x8] sm:$0xff] %vm277_vm4, %v649_v25 }
 0x767   :  { %966 = shalt.err (!%p963_p4)
}
 0x768   :  { %s967_s28 = scalar_lea.hbm %s1271_s14, 256 }
 0x769   :  { %p968_p5 = scmp.ne.s32.totalorder %s1271_s14, %s967_s28  ;;  %p971_p6 = scmp.lt.u32.totalorder %s967_s28, %s1271_s14 }
 0x76b   :  { %p973_p7 = pnand %p971_p6, %p968_p5 }
 0x76d   :  { %976 = shalt.err (!%p973_p7)
}
 0x76e   :  { %s999_s0 = smov 128   ;;  %s1000_s15 = smov 8  }
 0x76f   :  { %663 = dma.vmem_to_hbm [thread:$0]  %s658_s27, 256, %s1271_s14, [#allocation4], %s999_s0, %s999_s0, %s1000_s15  }
 0x770   :  { %985 = dma.done.wait [#allocation4], 256  }
 0x771   :  { %986 = vsyncadd [#allocation4], 4294967040 }
 0x772   :  { %667 = vsyncpa [#allocation3], 1 }
 0x773   :  { %668 = vsyncpa [#allocation6], 1 }
 0x774   :  { %669 = vsyncpa [#allocation9], 1 }
 0x775   :  { %670 = vsyncpa [#allocation12], 1 }
 0x776   :  { %671 = vsyncpa [#allocation4], 1 }

</bundles_post_ra>
